<compile_context>
chip_gen: v7x
topology: tpu7x:2x2x1
jax: 0.10.0
libtpu: 0.0.40
codegen_flags: <defaults>
</compile_context>

<pallas_src>
import functools

import jax
import jax.numpy as jnp
from jax.experimental import pallas as pl
from jax.experimental.pallas import tpu as pltpu

VOCAB = 100
SEQ_LEN = 8
HIDDEN = 32
NUM_RELATIONS = 3
EXPL_OUT = 16
NUM_CLASSES = 2
D_MODEL = 32

VPAD = 128               # padded vocab / contraction width (lane-dense)
HEAD_OUT = 128           # lane-dense output slab: [logits | decoder_input | 0pad]

# weight-slab row offsets (all blocks are 128 lanes wide, f32)
EW_OFF = 0                                   # 4 x [128,128]: emb@W_self, emb@W_r
EXPL_OFF = (NUM_RELATIONS + 1) * VPAD        # 512: [128,128] explanation Linear
HEADT_OFF = EXPL_OFF + VPAD                  # 640: [128,128] fc head (tweet part)
HEADE_OFF = HEADT_OFF + VPAD                 # 768: [128,128] fc head (expl) + projection
BIAS_OFF = HEADE_OFF + VPAD                  # 896: row0 rgcn_b, row1 expl_b, row2 fc/proj_b
W_ROWS = BIAS_OFF + 8                        # 904 (multiple of 8)


def _round8(n):
    return ((n + 7) // 8) * 8


def _vmem():
    # Everything is tiny; keep all operands fully resident in VMEM, gridless.
    return pl.BlockSpec(memory_space=pltpu.MemorySpace.VMEM)


# ------------------------------ Pallas kernel ------------------------------

def fused_forward_kernel(pool_ref, graph_ref, w_ref, o_ref, *, npad, bpad):
    pool = pool_ref[...]                                            # [Npad, 128]

    # RGCN: h = ReLU(sum_r (A_r @ x) @ W_r + b) with A_0 = I / W_0 = W_self and
    # x = pool @ emb folded into EW_r = emb @ W_r (128-lane zero-padded blocks).
    a_all = graph_ref[pl.ds(0, (NUM_RELATIONS + 1) * npad), :]      # [(R+1)Npad, Npad]
    pool_stack = jnp.dot(a_all, pool,
                         preferred_element_type=jnp.float32)        # [(R+1)Npad, 128]

    acc = jnp.dot(pool_stack[0:npad, :], w_ref[pl.ds(EW_OFF, VPAD), :],
                  preferred_element_type=jnp.float32)               # [Npad, 128]
    for r in range(1, NUM_RELATIONS + 1):                           # static unroll
        acc = acc + jnp.dot(pool_stack[r * npad:(r + 1) * npad, :],
                            w_ref[pl.ds(EW_OFF + r * VPAD, VPAD), :],
                            preferred_element_type=jnp.float32)
    h = jnp.maximum(acc + w_ref[pl.ds(BIAS_OFF, 1), :], 0.0)        # [Npad, 128]

    # tweet gather + evidence mean-pool: ONE selection matmul, sublane split.
    sel = graph_ref[pl.ds((NUM_RELATIONS + 1) * npad, 2 * bpad), :]  # [2Bpad, Npad]
    sel_out = jnp.dot(sel, h, preferred_element_type=jnp.float32)    # [2Bpad, 128]
    tweet = sel_out[0:bpad, :]                                       # [Bpad, 128]
    evi = sel_out[bpad:2 * bpad, :]                                  # [Bpad, 128]

    # explanation model: Linear + ReLU on count-correct evidence mean.
    expl = jnp.maximum(
        jnp.dot(evi, w_ref[pl.ds(EXPL_OFF, VPAD), :],
                preferred_element_type=jnp.float32)
        + w_ref[pl.ds(BIAS_OFF + 1, 1), :], 0.0)                     # [Bpad, 128]

    # fused fc head + projection: lane-dense [Bpad, 128] slab
    # (lanes 0:2 logits, lanes 2:34 decoder_input, rest zero).
    out = (jnp.dot(tweet, w_ref[pl.ds(HEADT_OFF, VPAD), :],
                   preferred_element_type=jnp.float32)
           + jnp.dot(expl, w_ref[pl.ds(HEADE_OFF, VPAD), :],
                     preferred_element_type=jnp.float32)
           + w_ref[pl.ds(BIAS_OFF + 2, 1), :])
    o_ref[...] = out


# ------------------------------- JAX wrapper --------------------------------

def init_params(key):
    keys = jax.random.split(key, 10)

    def w(k, shape, scale=0.05):
        return (scale * jax.random.normal(k, shape)).astype(jnp.float32)

    return {
        "embedding":   w(keys[0], (VOCAB, HIDDEN)),
        "rgcn_w_rel":  w(keys[1], (NUM_RELATIONS, HIDDEN, HIDDEN)),
        "rgcn_w_self": w(keys[2], (HIDDEN, HIDDEN)),
        "rgcn_b":      w(keys[3], (HIDDEN,), 0.01),
        "expl_w":      w(keys[4], (HIDDEN, EXPL_OUT)),
        "expl_b":      w(keys[5], (EXPL_OUT,), 0.01),
        "fc_w":        w(keys[6], (HIDDEN + EXPL_OUT, NUM_CLASSES)),
        "fc_b":        w(keys[7], (NUM_CLASSES,), 0.01),
        "proj_w":      w(keys[8], (EXPL_OUT, D_MODEL)),
        "proj_b":      w(keys[9], (D_MODEL,), 0.01),
    }


def pack_weights(params):
    """Coalesce every constant operand into one lane-dense [904, 128] slab."""
    emb_pad = jnp.zeros((VPAD, HIDDEN), jnp.float32).at[:VOCAB].set(
        params["embedding"])                                          # [128, 32]
    w_list = [params["rgcn_w_self"]] + [params["rgcn_w_rel"][r]
                                        for r in range(NUM_RELATIONS)]

    slab = jnp.zeros((W_ROWS, 128), jnp.float32)
    for r, w_r in enumerate(w_list):                                  # fold embedding
        slab = slab.at[EW_OFF + r * VPAD:EW_OFF + (r + 1) * VPAD,
                       :HIDDEN].set(emb_pad @ w_r)
    slab = slab.at[EXPL_OFF:EXPL_OFF + HIDDEN, :EXPL_OUT].set(params["expl_w"])
    slab = slab.at[HEADT_OFF:HEADT_OFF + HIDDEN, :NUM_CLASSES].set(
        params["fc_w"][:HIDDEN])
    slab = slab.at[HEADE_OFF:HEADE_OFF + EXPL_OUT, :NUM_CLASSES].set(
        params["fc_w"][HIDDEN:])
    slab = slab.at[HEADE_OFF:HEADE_OFF + EXPL_OUT,
                   NUM_CLASSES:NUM_CLASSES + D_MODEL].set(params["proj_w"])
    slab = slab.at[BIAS_OFF, :HIDDEN].set(params["rgcn_b"])
    slab = slab.at[BIAS_OFF + 1, :EXPL_OUT].set(params["expl_b"])
    slab = slab.at[BIAS_OFF + 2, :NUM_CLASSES].set(params["fc_b"])
    slab = slab.at[BIAS_OFF + 2, NUM_CLASSES:NUM_CLASSES + D_MODEL].set(
        params["proj_b"])
    return slab


def pad_evidence_indices(evidence_indices, evidence_counts, max_evidences):
    """Host-side: turn the ragged evidence layout into static arrays."""
    idx_rows, mask_rows = [], []
    pos = 0
    for n_e in evidence_counts:
        row = list(evidence_indices[pos:pos + n_e]) + [0] * (max_evidences - n_e)
        msk = [1.0] * n_e + [0.0] * (max_evidences - n_e)
        idx_rows.append(row)
        mask_rows.append(msk)
        pos += n_e
    return (jnp.array(idx_rows, jnp.int32),
            jnp.array(mask_rows, jnp.float32))


def rumor_detection_forward(weight_slab, input_ids, attention_mask, edge_index,
                            edge_type, tweet_indices, evidence_matrix,
                            evidence_mask):
    num_nodes = input_ids.shape[0]
    batch = tweet_indices.shape[0]
    npad = _round8(num_nodes)
    bpad = _round8(batch)
    mask = attention_mask.astype(jnp.float32)

    # encoder pooling weights: masked token-count scatter (row-normalized),
    # padded to [Npad, 128] — replaces the [N, SEQ, VOCAB] one_hot blow-up.
    node_ids = jnp.broadcast_to(
        jnp.arange(num_nodes, dtype=jnp.int32)[:, None], input_ids.shape)
    tok_counts = jnp.zeros((npad, VPAD), jnp.float32).at[
        node_ids, input_ids].add(mask)
    pool_w = tok_counts / jnp.maximum(
        tok_counts.sum(axis=-1, keepdims=True), 1.0)                  # [Npad, 128]

    # per-relation row-normalized adjacency with an identity "self" block,
    # stacked along sublanes: [I; A0; A1; A2]  -> [(R+1)*Npad, Npad].
    src, dst = edge_index[0], edge_index[1]
    adj = jnp.zeros((NUM_RELATIONS, npad, npad), jnp.float32).at[
        edge_type, dst, src].add(1.0)
    adj = adj / jnp.maximum(adj.sum(axis=-1, keepdims=True), 1.0)
    a_all = jnp.concatenate(
        [jnp.eye(npad, dtype=jnp.float32)[None], adj], axis=0
    ).reshape((NUM_RELATIONS + 1) * npad, npad)

    # tweet selection + count-correct evidence mean-pool rows (scatter-built).
    tsel = jnp.zeros((bpad, npad), jnp.float32).at[
        jnp.arange(batch, dtype=jnp.int32), tweet_indices].set(1.0)
    evi_w = evidence_mask / jnp.maximum(
        evidence_mask.sum(axis=1, keepdims=True), 1.0)
    brow = jnp.broadcast_to(
        jnp.arange(batch, dtype=jnp.int32)[:, None], evidence_matrix.shape)
    epool = jnp.zeros((bpad, npad), jnp.float32).at[
        brow, evidence_matrix].add(evi_w)

    # single graph-dependent operand: [ (R+1)*Npad + 2*Bpad, Npad ]
    graph_mats = jnp.concatenate([a_all, tsel, epool], axis=0)

    kernel = functools.partial(fused_forward_kernel, npad=npad, bpad=bpad)
    # NOTE: gridless on purpose at these sizes; for larger batch/graph add a
    # batch grid axis + dimension_semantics=("parallel",) to use both v7x TCs.
    out = pl.pallas_call(
        kernel,
        out_shape=jax.ShapeDtypeStruct((bpad, HEAD_OUT), jnp.float32),
        in_specs=[_vmem(), _vmem(), _vmem()],
        out_specs=_vmem(),
    )(pool_w, graph_mats, weight_slab)

    logits = out[:batch, :NUM_CLASSES]                                # [B, C]
    decoder_input = out[:batch, NUM_CLASSES:NUM_CLASSES + D_MODEL]    # [B, D_MODEL]

    # TODO(synk): RobertaTokenizer/BartTokenizer and BartForConditionalGeneration
    # beam-search generate() + batch_decode are host-side / pretrained-model ops
    # with no Pallas equivalent; we return the projected decoder conditioning
    # (encoder_hidden_states input) instead of generated text.
    return logits, decoder_input


if __name__ == "__main__":
    key = jax.random.PRNGKey(0)
    pkey, ikey = jax.random.split(key)
    params = init_params(pkey)
    weight_slab = pack_weights(params)

    # Synthetic batch: 2 tweets; tweet0 has 2 evidences, tweet1 has 3.
    # Node order matches the original forward's flattening:
    # [t0, e00, e01, t1, e10, e11, e12]
    tweet_indices = jnp.array([0, 3], jnp.int32)
    evidence_indices = [1, 2, 4, 5, 6]
    evidence_counts = [2, 3]
    max_evidences = 3
    num_nodes = 7

    evidence_matrix, evidence_mask = pad_evidence_indices(
        evidence_indices, evidence_counts, max_evidences)

    input_ids = jax.random.randint(ikey, (num_nodes, SEQ_LEN), 1, VOCAB,
                                   dtype=jnp.int32)
    attention_mask = jnp.ones((num_nodes, SEQ_LEN), jnp.int32)
    attention_mask = attention_mask.at[:, SEQ_LEN - 2:].set(0)

    edge_src = jnp.array([1, 2, 4, 5, 6, 0, 0, 3, 3, 3], jnp.int32)
    edge_dst = jnp.array([0, 0, 3, 3, 3, 1, 2, 4, 5, 6], jnp.int32)
    edge_type = jnp.array([0, 0, 0, 0, 0, 1, 1, 1, 1, 2], jnp.int32)
    edge_index = jnp.stack([edge_src, edge_dst])

    forward = jax.jit(rumor_detection_forward)
    logits, decoder_input = forward(
        weight_slab, input_ids, attention_mask, edge_index, edge_type,
        tweet_indices, evidence_matrix, evidence_mask)
    jax.block_until_ready((logits, decoder_input))

    assert logits.shape == (2, NUM_CLASSES)
    assert decoder_input.shape == (2, D_MODEL)
    assert bool(jnp.all(jnp.isfinite(logits)))
    assert bool(jnp.all(jnp.isfinite(decoder_input)))
    print("KERNEL_OK")
</pallas_src>

<mosaic_0001>
module attributes {stable_mosaic.version = 11 : i64} {
  func.func @fused_forward_kernel(%arg0: memref<8x128xf32, #tpu.memory_space<vmem>>, %arg1: memref<48x8xf32, #tpu.memory_space<vmem>>, %arg2: memref<904x128xf32, #tpu.memory_space<vmem>>, %arg3: memref<8x128xf32, #tpu.memory_space<vmem>>) attributes {dimension_semantics = [], scalar_prefetch = 0 : i64, scratch_operands = 0 : i64, tpu.core_type = #tpu.core_type<tc>} {
    %c0 = arith.constant 0 : index
    %c0_0 = arith.constant 0 : index
    %0 = vector.load %arg0[%c0, %c0_0] : memref<8x128xf32, #tpu.memory_space<vmem>>, vector<8x128xf32>
    %c0_1 = arith.constant 0 : index
    %c0_2 = arith.constant 0 : index
    %1 = vector.load %arg1[%c0_1, %c0_2] : memref<48x8xf32, #tpu.memory_space<vmem>>, vector<32x8xf32>
    %cst = arith.constant dense<0.000000e+00> : vector<32x128xf32>
    %2 = tpu.matmul %1, %0, %cst {dimension_numbers = #tpu.dot_dimension_numbers<[1], [0], [0], [1], [0, 0, 1, 1], [], []>} : vector<32x8xf32>, vector<8x128xf32>, vector<32x128xf32> -> vector<32x128xf32>
    %3 = vector.extract_strided_slice %2 {offsets = [0, 0], sizes = [8, 128], strides = [1, 1]} : vector<32x128xf32> to vector<8x128xf32>
    %c0_3 = arith.constant 0 : index
    %c0_4 = arith.constant 0 : index
    %4 = vector.load %arg2[%c0_3, %c0_4] : memref<904x128xf32, #tpu.memory_space<vmem>>, vector<128x128xf32>
    %cst_5 = arith.constant dense<0.000000e+00> : vector<8x128xf32>
    %5 = tpu.matmul %3, %4, %cst_5 {dimension_numbers = #tpu.dot_dimension_numbers<[1], [0], [0], [1], [0, 0, 1, 1], [], []>} : vector<8x128xf32>, vector<128x128xf32>, vector<8x128xf32> -> vector<8x128xf32>
    %6 = vector.extract_strided_slice %2 {offsets = [8, 0], sizes = [8, 128], strides = [1, 1]} : vector<32x128xf32> to vector<8x128xf32>
    %c128 = arith.constant 128 : index
    %c0_6 = arith.constant 0 : index
    %7 = vector.load %arg2[%c128, %c0_6] : memref<904x128xf32, #tpu.memory_space<vmem>>, vector<128x128xf32>
    %cst_7 = arith.constant dense<0.000000e+00> : vector<8x128xf32>
    %8 = tpu.matmul %6, %7, %cst_7 {dimension_numbers = #tpu.dot_dimension_numbers<[1], [0], [0], [1], [0, 0, 1, 1], [], []>} : vector<8x128xf32>, vector<128x128xf32>, vector<8x128xf32> -> vector<8x128xf32>
    %9 = arith.addf %5, %8 : vector<8x128xf32>
    %10 = vector.extract_strided_slice %2 {offsets = [16, 0], sizes = [8, 128], strides = [1, 1]} : vector<32x128xf32> to vector<8x128xf32>
    %c256 = arith.constant 256 : index
    %c0_8 = arith.constant 0 : index
    %11 = vector.load %arg2[%c256, %c0_8] : memref<904x128xf32, #tpu.memory_space<vmem>>, vector<128x128xf32>
    %cst_9 = arith.constant dense<0.000000e+00> : vector<8x128xf32>
    %12 = tpu.matmul %10, %11, %cst_9 {dimension_numbers = #tpu.dot_dimension_numbers<[1], [0], [0], [1], [0, 0, 1, 1], [], []>} : vector<8x128xf32>, vector<128x128xf32>, vector<8x128xf32> -> vector<8x128xf32>
    %13 = arith.addf %9, %12 : vector<8x128xf32>
    %14 = vector.extract_strided_slice %2 {offsets = [24, 0], sizes = [8, 128], strides = [1, 1]} : vector<32x128xf32> to vector<8x128xf32>
    %c384 = arith.constant 384 : index
    %c0_10 = arith.constant 0 : index
    %15 = vector.load %arg2[%c384, %c0_10] : memref<904x128xf32, #tpu.memory_space<vmem>>, vector<128x128xf32>
    %cst_11 = arith.constant dense<0.000000e+00> : vector<8x128xf32>
    %16 = tpu.matmul %14, %15, %cst_11 {dimension_numbers = #tpu.dot_dimension_numbers<[1], [0], [0], [1], [0, 0, 1, 1], [], []>} : vector<8x128xf32>, vector<128x128xf32>, vector<8x128xf32> -> vector<8x128xf32>
    %17 = arith.addf %13, %16 : vector<8x128xf32>
    %c896 = arith.constant 896 : index
    %c0_12 = arith.constant 0 : index
    %18 = vector.load %arg2[%c896, %c0_12] : memref<904x128xf32, #tpu.memory_space<vmem>>, vector<1x128xf32>
    %19 = vector.broadcast %18 : vector<1x128xf32> to vector<8x128xf32>
    %20 = arith.addf %17, %19 : vector<8x128xf32>
    %cst_13 = arith.constant 0.000000e+00 : f32
    %21 = vector.broadcast %cst_13 : f32 to vector<8x128xf32>
    %22 = arith.maximumf %20, %21 : vector<8x128xf32>
    %c32 = arith.constant 32 : index
    %c0_14 = arith.constant 0 : index
    %23 = vector.load %arg1[%c32, %c0_14] : memref<48x8xf32, #tpu.memory_space<vmem>>, vector<16x8xf32>
    %cst_15 = arith.constant dense<0.000000e+00> : vector<16x128xf32>
    %24 = tpu.matmul %23, %22, %cst_15 {dimension_numbers = #tpu.dot_dimension_numbers<[1], [0], [0], [1], [0, 0, 1, 1], [], []>} : vector<16x8xf32>, vector<8x128xf32>, vector<16x128xf32> -> vector<16x128xf32>
    %25 = vector.extract_strided_slice %24 {offsets = [0, 0], sizes = [8, 128], strides = [1, 1]} : vector<16x128xf32> to vector<8x128xf32>
    %26 = vector.extract_strided_slice %24 {offsets = [8, 0], sizes = [8, 128], strides = [1, 1]} : vector<16x128xf32> to vector<8x128xf32>
    %c512 = arith.constant 512 : index
    %c0_16 = arith.constant 0 : index
    %27 = vector.load %arg2[%c512, %c0_16] : memref<904x128xf32, #tpu.memory_space<vmem>>, vector<128x128xf32>
    %cst_17 = arith.constant dense<0.000000e+00> : vector<8x128xf32>
    %28 = tpu.matmul %26, %27, %cst_17 {dimension_numbers = #tpu.dot_dimension_numbers<[1], [0], [0], [1], [0, 0, 1, 1], [], []>} : vector<8x128xf32>, vector<128x128xf32>, vector<8x128xf32> -> vector<8x128xf32>
    %c897 = arith.constant 897 : index
    %c0_18 = arith.constant 0 : index
    %29 = vector.load %arg2[%c897, %c0_18] : memref<904x128xf32, #tpu.memory_space<vmem>>, vector<1x128xf32>
    %30 = vector.broadcast %29 : vector<1x128xf32> to vector<8x128xf32>
    %31 = arith.addf %28, %30 : vector<8x128xf32>
    %cst_19 = arith.constant 0.000000e+00 : f32
    %32 = vector.broadcast %cst_19 : f32 to vector<8x128xf32>
    %33 = arith.maximumf %31, %32 : vector<8x128xf32>
    %c640 = arith.constant 640 : index
    %c0_20 = arith.constant 0 : index
    %34 = vector.load %arg2[%c640, %c0_20] : memref<904x128xf32, #tpu.memory_space<vmem>>, vector<128x128xf32>
    %cst_21 = arith.constant dense<0.000000e+00> : vector<8x128xf32>
    %35 = tpu.matmul %25, %34, %cst_21 {dimension_numbers = #tpu.dot_dimension_numbers<[1], [0], [0], [1], [0, 0, 1, 1], [], []>} : vector<8x128xf32>, vector<128x128xf32>, vector<8x128xf32> -> vector<8x128xf32>
    %c768 = arith.constant 768 : index
    %c0_22 = arith.constant 0 : index
    %36 = vector.load %arg2[%c768, %c0_22] : memref<904x128xf32, #tpu.memory_space<vmem>>, vector<128x128xf32>
    %cst_23 = arith.constant dense<0.000000e+00> : vector<8x128xf32>
    %37 = tpu.matmul %33, %36, %cst_23 {dimension_numbers = #tpu.dot_dimension_numbers<[1], [0], [0], [1], [0, 0, 1, 1], [], []>} : vector<8x128xf32>, vector<128x128xf32>, vector<8x128xf32> -> vector<8x128xf32>
    %38 = arith.addf %35, %37 : vector<8x128xf32>
    %c898 = arith.constant 898 : index
    %c0_24 = arith.constant 0 : index
    %39 = vector.load %arg2[%c898, %c0_24] : memref<904x128xf32, #tpu.memory_space<vmem>>, vector<1x128xf32>
    %40 = vector.broadcast %39 : vector<1x128xf32> to vector<8x128xf32>
    %41 = arith.addf %38, %40 : vector<8x128xf32>
    %c0_25 = arith.constant 0 : index
    %c0_26 = arith.constant 0 : index
    %42 = vector.load %arg3[%c0_25, %c0_26] : memref<8x128xf32, #tpu.memory_space<vmem>>, vector<8x128xf32>
    tpu.vector_store %arg3[%c0_25, %c0_26], %41 {strides = array<i32>} : memref<8x128xf32, #tpu.memory_space<vmem>>, vector<8x128xf32>,
    return
  }
}

</mosaic_0001>

<bundles_post_ra>
// kernel: rumor_detection_forward.1
= control target key start
LH: loop header
LB: loop body
LE: loop exit
PB: predicated region body
PF: predicated region fallthrough
CT: control target
= control target key end

     0   :  { %vm19_vm0 = vcmask 64512   ;;  %v1393_v3 = vmov 0.0|0.0   ;;  %vm1394_vm1 = vmmov 0   ;;  %v1395_v54 = vmov 0.0   ;;  %s1864_s0 = inlined_call_operand.vmem [shape: f32[8,128], index: 0, kind: input, shape index: {}]   ;;  %s1865_s1 = inlined_call_operand.vmem [shape: f32[48,8], index: 1, kind: input, shape index: {}]   ;;  %s1866_s2 = inlined_call_operand.vmem [shape: f32[904,128], index: 2, kind: input, shape index: {}]   ;;  %s1867_s3 = inlined_call_operand.vmem [shape: f32[8,128], index: 3, kind: output, shape index: {}]  }
   0x1   :  { %v14_v0 = vld [vmem:[%s1864_s0] sm:$0xff]  ;;  %v16_v2 = vld [vmem:[%s1865_s1 + $0x8] sm:$0xff]  ;;  %1246 = vmatprep.subr.bf16.mxu0 %v1393_v3  ;;  %v17_v4 = vld [vmem:[%s1865_s1 + $0x10] sm:$0xff]  ;;  %1039 = vmatprep.mubr.msk.f32.mxu0 %vm1394_vm1, %v1395_v54 }
   0x2   :  { %v15_v1 = vld [vmem:[%s1865_s1] sm:$0xff]  ;;  %964 = vmatprep.subr.mxu1 %v14_v0  ;;  %v134_v6 = vld [vmem:[%s1866_s2 + $0x88] sm:$0xff]  ;;  %v135_v11 = vld [vmem:[%s1866_s2 + $0x90] sm:$0xff] }
   0x3   :  { %966 = vmatprep.mubr.msk.f32.mxu1 %vm19_vm0, %v15_v1  ;;  %v133_v5 = vld [vmem:[%s1866_s2 + $0x80] sm:$0xff]  ;;  %965 = vmatpush3.msra.mxu1 %v14_v0  ;;  %v118_v8 = vld [vmem:[%s1866_s2 + $0x8] sm:$0xff]  ;;  %v136_v12 = vld [vmem:[%s1866_s2 + $0x98] sm:$0xff] }
   0x4   :  { %v117_v7 = vld [vmem:[%s1866_s2] sm:$0xff]  ;;  %967 = vmatmul.mubr.msk.f32.vlgmr.msra.gmra.mrb[0].mxu1 %vm19_vm0, %v16_v2  ;;  %1222 = vmatprep.subr.bf16.mxu1 %v1393_v3  ;;  %v1223_v9 = vpack.c.bf16 %v134_v6, %v133_v5  ;;  %v119_v13 = vld [vmem:[%s1866_s2 + $0x10] sm:$0xff]  ;;  %v18_v14 = vld [vmem:[%s1865_s1 + $0x18] sm:$0xff]  ;;  %v1226_v16 = vpack.c.bf16 %v136_v12, %v135_v11 }
   0x5   :  { %v1247_v10 = vpack.c.bf16 %v118_v8, %v117_v7  ;;  %969 = vmatprep.mubr.msk.f32.mxu1 %vm19_vm0, %v17_v4  ;;  %v120_v15 = vld [vmem:[%s1866_s2 + $0x18] sm:$0xff]  ;;  %v137_v18 = vld [vmem:[%s1866_s2 + $0xa0] sm:$0xff]  ;;  %v138_v19 = vld [vmem:[%s1866_s2 + $0xa8] sm:$0xff] }
   0x6   :  { %1224 = vmatpush3.bf16.msra.mxu1 %v1223_v9  ;;  %v1250_v17 = vpack.c.bf16 %v120_v15, %v119_v13  ;;  %v121_v20 = vld [vmem:[%s1866_s2 + $0x20] sm:$0xff]  ;;  %v122_v21 = vld [vmem:[%s1866_s2 + $0x28] sm:$0xff]  ;;  %v1229_v22 = vpack.c.bf16 %v138_v19, %v137_v18  ;;  %v139_v24 = vld [vmem:[%s1866_s2 + $0xb0] sm:$0xff] }
   0x7   :  { %1248 = vmatpush3.bf16.msra.mxu0 %v1247_v10  ;;  %1225 = vmatprep.subr.bf16.mxu1 %v1393_v3  ;;  %v1253_v23 = vpack.c.bf16 %v122_v21, %v121_v20  ;;  %v140_v25 = vld [vmem:[%s1866_s2 + $0xb8] sm:$0xff]  ;;  %v123_v26 = vld [vmem:[%s1866_s2 + $0x30] sm:$0xff]  ;;  %v141_v30 = vld [vmem:[%s1866_s2 + $0xc0] sm:$0xff] }
   0x8   :  { %1249 = vmatprep.subr.bf16.mxu0 %v1393_v3  ;;  %970 = vmatmul.mubr.msk.f32.gmra.mrb[2].mxu1 %vm19_vm0, %v18_v14  ;;  %v124_v27 = vld [vmem:[%s1866_s2 + $0x38] sm:$0xff]  ;;  %v1232_v28 = vpack.c.bf16 %v140_v25, %v139_v24  ;;  %v142_v31 = vld [vmem:[%s1866_s2 + $0xc8] sm:$0xff]  ;;  %v125_v32 = vld [vmem:[%s1866_s2 + $0x40] sm:$0xff] }
   0x9   :  { %v1256_v29 = vpack.c.bf16 %v124_v27, %v123_v26  ;;  %v126_v33 = vld [vmem:[%s1866_s2 + $0x48] sm:$0xff]  ;;  %v1235_v34 = vpack.c.bf16 %v142_v31, %v141_v30  ;;  %v143_v36 = vld [vmem:[%s1866_s2 + $0xd0] sm:$0xff]  ;;  %v144_v37 = vld [vmem:[%s1866_s2 + $0xd8] sm:$0xff]  ;;  %1004 = vmatprep.mubr.msk.f32.mxu1 %vm1394_vm1, %v1395_v54 }
   0xa   :  { %1227 = vmatpush3.bf16.msra.mxu1 %v1226_v16  ;;  %v1259_v35 = vpack.c.bf16 %v126_v33, %v125_v32  ;;  %v127_v38 = vld [vmem:[%s1866_s2 + $0x50] sm:$0xff]  ;;  %v128_v39 = vld [vmem:[%s1866_s2 + $0x58] sm:$0xff]  ;;  %v1238_v40 = vpack.c.bf16 %v144_v37, %v143_v36  ;;  %v145_v42 = vld [vmem:[%s1866_s2 + $0xe0] sm:$0xff] }
   0xb   :  { %1251 = vmatpush3.bf16.msra.mxu0 %v1250_v17  ;;  %1228 = vmatprep.subr.bf16.mxu1 %v1393_v3  ;;  %v1262_v41 = vpack.c.bf16 %v128_v39, %v127_v38  ;;  %v146_v43 = vld [vmem:[%s1866_s2 + $0xe8] sm:$0xff]  ;;  %v129_v44 = vld [vmem:[%s1866_s2 + $0x60] sm:$0xff]  ;;  %v147_v48 = vld [vmem:[%s1866_s2 + $0xf0] sm:$0xff] }
   0xc   :  { %1252 = vmatprep.subr.bf16.mxu0 %v1393_v3  ;;  %v130_v45 = vld [vmem:[%s1866_s2 + $0x68] sm:$0xff]  ;;  %v1241_v46 = vpack.c.bf16 %v146_v43, %v145_v42  ;;  %v148_v49 = vld [vmem:[%s1866_s2 + $0xf8] sm:$0xff]  ;;  %v131_v50 = vld [vmem:[%s1866_s2 + $0x70] sm:$0xff] }
   0xd   :  { %v1265_v47 = vpack.c.bf16 %v130_v45, %v129_v44  ;;  %v132_v51 = vld [vmem:[%s1866_s2 + $0x78] sm:$0xff]  ;;  %v1244_v52 = vpack.c.bf16 %v148_v49, %v147_v48  ;;  %v289_v55 = vld [vmem:[%s1866_s2 + $0x100] sm:$0xff]  ;;  %v290_v56 = vld [vmem:[%s1866_s2 + $0x108] sm:$0xff] }
   0xe   :  { %1230 = vmatpush3.bf16.msra.mxu1 %v1229_v22  ;;  %v1268_v53 = vpack.c.bf16 %v132_v51, %v131_v50  ;;  %v376_v57 = vld [vmem:[%s1866_s2 + $0x180] sm:$0xff]  ;;  %v377_v58 = vld [vmem:[%s1866_s2 + $0x188] sm:$0xff]  ;;  %v1271_v59 = vpack.c.bf16 %v290_v56, %v289_v55  ;;  %v291_v61 = vld [vmem:[%s1866_s2 + $0x110] sm:$0xff] }
   0xf   :  { %1254 = vmatpush3.bf16.msra.mxu0 %v1253_v23  ;;  %1231 = vmatprep.subr.bf16.mxu1 %v1393_v3  ;;  %v1295_v60 = vpack.c.bf16 %v377_v58, %v376_v57  ;;  %v292_v62 = vld [vmem:[%s1866_s2 + $0x118] sm:$0xff]  ;;  %v378_v0 = vld [vmem:[%s1866_s2 + $0x190] sm:$0xff]  ;;  %v293_v6 = vld [vmem:[%s1866_s2 + $0x120] sm:$0xff] }
  0x10   :  { %1255 = vmatprep.subr.bf16.mxu0 %v1393_v3  ;;  %v379_v1 = vld [vmem:[%s1866_s2 + $0x198] sm:$0xff]  ;;  %v1274_v4 = vpack.c.bf16 %v292_v62, %v291_v61  ;;  %v294_v7 = vld [vmem:[%s1866_s2 + $0x128] sm:$0xff]  ;;  %v380_v8 = vld [vmem:[%s1866_s2 + $0x1a0] sm:$0xff] }
  0x11   :  { %v1298_v5 = vpack.c.bf16 %v379_v1, %v378_v0  ;;  %v381_v9 = vld [vmem:[%s1866_s2 + $0x1a8] sm:$0xff]  ;;  %v1277_v12 = vpack.c.bf16 %v294_v7, %v293_v6  ;;  %v295_v14 = vld [vmem:[%s1866_s2 + $0x130] sm:$0xff]  ;;  %v296_v15 = vld [vmem:[%s1866_s2 + $0x138] sm:$0xff] }
  0x12   :  { %1233 = vmatpush3.bf16.msra.mxu1 %v1232_v28  ;;  %v1301_v13 = vpack.c.bf16 %v381_v9, %v380_v8  ;;  %v382_v16 = vld [vmem:[%s1866_s2 + $0x1b0] sm:$0xff]  ;;  %v383_v17 = vld [vmem:[%s1866_s2 + $0x1b8] sm:$0xff]  ;;  %v1280_v18 = vpack.c.bf16 %v296_v15, %v295_v14  ;;  %v297_v20 = vld [vmem:[%s1866_s2 + $0x140] sm:$0xff] }
  0x13   :  { %1257 = vmatpush3.bf16.msra.mxu0 %v1256_v29  ;;  %1234 = vmatprep.subr.bf16.mxu1 %v1393_v3  ;;  %v1304_v19 = vpack.c.bf16 %v383_v17, %v382_v16  ;;  %v298_v21 = vld [vmem:[%s1866_s2 + $0x148] sm:$0xff]  ;;  %v384_v22 = vld [vmem:[%s1866_s2 + $0x1c0] sm:$0xff]  ;;  %v299_v26 = vld [vmem:[%s1866_s2 + $0x150] sm:$0xff] }
  0x14   :  { %1258 = vmatprep.subr.bf16.mxu0 %v1393_v3  ;;  %v385_v23 = vld [vmem:[%s1866_s2 + $0x1c8] sm:$0xff]  ;;  %v1283_v24 = vpack.c.bf16 %v298_v21, %v297_v20  ;;  %v300_v27 = vld [vmem:[%s1866_s2 + $0x158] sm:$0xff]  ;;  %v386_v28 = vld [vmem:[%s1866_s2 + $0x1d0] sm:$0xff] }
  0x15   :  { %v1307_v25 = vpack.c.bf16 %v385_v23, %v384_v22  ;;  %v387_v29 = vld [vmem:[%s1866_s2 + $0x1d8] sm:$0xff]  ;;  %v1286_v30 = vpack.c.bf16 %v300_v27, %v299_v26  ;;  %v301_v32 = vld [vmem:[%s1866_s2 + $0x160] sm:$0xff]  ;;  %v302_v33 = vld [vmem:[%s1866_s2 + $0x168] sm:$0xff] }
  0x16   :  { %1236 = vmatpush3.bf16.msra.mxu1 %v1235_v34  ;;  %v1310_v31 = vpack.c.bf16 %v387_v29, %v386_v28  ;;  %v388_v34 = vld [vmem:[%s1866_s2 + $0x1e0] sm:$0xff]  ;;  %v1289_v36 = vpack.c.bf16 %v302_v33, %v301_v32  ;;  %v303_v38 = vld [vmem:[%s1866_s2 + $0x170] sm:$0xff]  ;;  %v304_v39 = vld [vmem:[%s1866_s2 + $0x178] sm:$0xff] }
  0x17   :  { %1260 = vmatpush3.bf16.msra.mxu0 %v1259_v35  ;;  %1237 = vmatprep.subr.bf16.mxu1 %v1393_v3  ;;  %v389_v35 = vld [vmem:[%s1866_s2 + $0x1e8] sm:$0xff]  ;;  %v1292_v42 = vpack.c.bf16 %v304_v39, %v303_v38  ;;  %v470_v44 = vld [vmem:[%s1865_s1 + $0x20] sm:$0xff]  ;;  %v556_v49 = vld [vmem:[%s1866_s2 + $0x218] sm:$0xff] }
  0x18   :  { %1261 = vmatprep.subr.bf16.mxu0 %v1393_v3  ;;  %v1313_v37 = vpack.c.bf16 %v389_v35, %v388_v34  ;;  %v553_v45 = vld [vmem:[%s1866_s2 + $0x200] sm:$0xff]  ;;  %v559_v55 = vld [vmem:[%s1866_s2 + $0x230] sm:$0xff]  ;;  %v560_v56 = vld [vmem:[%s1866_s2 + $0x238] sm:$0xff] }
  0x19   :  { %v557_v51 = vld [vmem:[%s1866_s2 + $0x220] sm:$0xff]  ;;  %v1328_v57 = vpack.c.bf16 %v560_v56, %v559_v55  ;;  %v563_v61 = vld [vmem:[%s1866_s2 + $0x250] sm:$0xff]  ;;  %v564_v62 = vld [vmem:[%s1866_s2 + $0x258] sm:$0xff] }
  0x1a   :  { %1239 = vmatpush3.bf16.msra.mxu1 %v1238_v40  ;;  %v390_v40 = vld [vmem:[%s1866_s2 + $0x1f0] sm:$0xff]  ;;  %v561_v58 = vld [vmem:[%s1866_s2 + $0x240] sm:$0xff]  ;;  %v566_v1 = vld [vmem:[%s1866_s2 + $0x268] sm:$0xff] }
  0x1b   :  { %1263 = vmatpush3.bf16.msra.mxu0 %v1262_v41  ;;  %1240 = vmatprep.subr.bf16.mxu1 %v1393_v3  ;;  %v391_v41 = vld [vmem:[%s1866_s2 + $0x1f8] sm:$0xff]  ;;  %v565_v0 = vld [vmem:[%s1866_s2 + $0x260] sm:$0xff]  ;;  %v471_v21 = vld [vmem:[%s1865_s1 + $0x28] sm:$0xff] }
  0x1c   :  { %1264 = vmatprep.subr.bf16.mxu0 %v1393_v3  ;;  %v1316_v43 = vpack.c.bf16 %v391_v41, %v390_v40  ;;  %v832_v16 = vld [vmem:[%s1866_s2 + $0x380] ss:$0 sm:$0xff]  ;;  %v662_v23 = vld [vmem:[%s1866_s2 + $0x308] sm:$0xff]  ;;  %v664_v26 = vld [vmem:[%s1866_s2 + $0x318] sm:$0xff] }
  0x1d   :  { %v661_v22 = vld [vmem:[%s1866_s2 + $0x300] sm:$0xff]  ;;  %v666_v29 = vld [vmem:[%s1866_s2 + $0x328] sm:$0xff]  ;;  %v668_v32 = vld [vmem:[%s1866_s2 + $0x338] sm:$0xff] }
  0x1e   :  { %1242 = vmatpush3.bf16.msra.mxu1 %v1241_v46  ;;  %v554_v46 = vld [vmem:[%s1866_s2 + $0x208] sm:$0xff]  ;;  %v665_v28 = vld [vmem:[%s1866_s2 + $0x320] sm:$0xff]  ;;  %v672_v38 = vld [vmem:[%s1866_s2 + $0x358] sm:$0xff] }
  0x1f   :  { %1266 = vmatpush3.bf16.msra.mxu0 %v1265_v47  ;;  %1243 = vmatprep.subr.bf16.mxu1 %v1393_v3  ;;  %v555_v47 = vld [vmem:[%s1866_s2 + $0x210] sm:$0xff]  ;;  %v1319_v48 = vpack.c.bf16 %v554_v46, %v553_v45  ;;  %v669_v34 = vld [vmem:[%s1866_s2 + $0x340] sm:$0xff]  ;;  %v670_v35 = vld [vmem:[%s1866_s2 + $0x348] sm:$0xff] }
  0x20   :  { %1267 = vmatprep.subr.bf16.mxu0 %v1393_v3  ;;  %v1322_v50 = vpack.c.bf16 %v556_v49, %v555_v47  ;;  %v673_v40 = vld [vmem:[%s1866_s2 + $0x360] sm:$0xff]  ;;  %v674_v41 = vld [vmem:[%s1866_s2 + $0x368] sm:$0xff]  ;;  %v647_v46 = vld [vmem:[%s1866_s2 + $0x290] sm:$0xff] }
  0x21   :  { %v648_v47 = vld [vmem:[%s1866_s2 + $0x298] sm:$0xff]  ;;  %v651_v55 = vld [vmem:[%s1866_s2 + $0x2b0] sm:$0xff] }
  0x22   :  { %1245 = vmatpush3.bf16.msra.mxu1 %v1244_v52  ;;  %v558_v52 = vld [vmem:[%s1866_s2 + $0x228] sm:$0xff] }
  0x23   :  { %1269 = vmatpush3.bf16.msra.mxu0 %v1268_v53  ;;  %1270 = vmatprep.subr.bf16.mxu1 %v1393_v3  ;;  %v1325_v53 = vpack.c.bf16 %v558_v52, %v557_v51  ;;  %v649_v51 = vld [vmem:[%s1866_s2 + $0x2a0] sm:$0xff]  ;;  %v650_v52 = vld [vmem:[%s1866_s2 + $0x2a8] sm:$0xff] }
  0x24   :  { %1294 = vmatprep.subr.bf16.mxu0 %v1393_v3 }
  0xd7   :  { %v968_v63 = vpop.f32.mrb[0].mxu1 }
  0xd8   :  { %v98_v2 = vpop.f32.mrb[1].mxu1  ;;  %1005 = vmatmul.mubr.f32.vlgmr.msra.gmra.mrb[4].mxu1 %v968_v63  ;;  %v1334_v63 = vpack.c.bf16 %v564_v62, %v563_v61  ;;  %v656_v61 = vld [vmem:[%s1866_s2 + $0x2d8] sm:$0xff] }
  0xd9   :  { %1272 = vmatpush3.bf16.msra.mxu1 %v1271_v59  ;;  %1040 = vmatmul.mubr.f32.vlgmr.msra.gmra.mrb[0].mxu0 %v98_v2  ;;  %v562_v59 = vld [vmem:[%s1866_s2 + $0x248] sm:$0xff]  ;;  %v1337_v2 = vpack.c.bf16 %v566_v1, %v565_v0 }
  0xda   :  { %1296 = vmatpush3.bf16.msra.mxu0 %v1295_v60  ;;  %1273 = vmatprep.subr.bf16.mxu1 %v1393_v3  ;;  %v1331_v60 = vpack.c.bf16 %v562_v59, %v561_v58  ;;  %v654_v58 = vld [vmem:[%s1866_s2 + $0x2c8] sm:$0xff] }
  0xdb   :  { %1297 = vmatprep.subr.bf16.mxu0 %v1393_v3  ;;  %v1591_v10 = vpop.f32.mrb[2].mxu1  ;;  %1074 = vmatprep.mubr.msk.f32.mxu1 %vm1394_vm1, %v1395_v54  ;;  %v658_v0 = vld [vmem:[%s1866_s2 + $0x2e8] sm:$0xff] }
  0xdc   :  { %v108_v11 = vpop.f32.mrb[3].mxu1  ;;  %1109 = vmatprep.mubr.msk.f32.mxu0 %vm1394_vm1, %v1395_v54 }
  0xdd   :  { %1275 = vmatpush3.bf16.msra.mxu1 %v1274_v4  ;;  %v567_v4 = vld [vmem:[%s1866_s2 + $0x270] sm:$0xff] }
  0xde   :  { %1299 = vmatpush3.bf16.msra.mxu0 %v1298_v5  ;;  %1276 = vmatprep.subr.bf16.mxu1 %v1393_v3  ;;  %v568_v5 = vld [vmem:[%s1866_s2 + $0x278] sm:$0xff] }
  0xdf   :  { %1300 = vmatprep.subr.bf16.mxu0 %v1393_v3  ;;  %v1340_v6 = vpack.c.bf16 %v568_v5, %v567_v4  ;;  %v660_v4 = vld [vmem:[%s1866_s2 + $0x2f8] sm:$0xff] }
  0xe1   :  { %1278 = vmatpush3.bf16.msra.mxu1 %v1277_v12 }
  0xe2   :  { %1302 = vmatpush3.bf16.msra.mxu0 %v1301_v13  ;;  %1279 = vmatprep.subr.bf16.mxu1 %v1393_v3 }
  0xe3   :  { %1303 = vmatprep.subr.bf16.mxu0 %v1393_v3 }
  0xe5   :  { %1281 = vmatpush3.bf16.msra.mxu1 %v1280_v18 }
  0xe6   :  { %1305 = vmatpush3.bf16.msra.mxu0 %v1304_v19  ;;  %1282 = vmatprep.subr.bf16.mxu1 %v1393_v3 }
  0xe7   :  { %1306 = vmatprep.subr.bf16.mxu0 %v1393_v3 }
  0xe9   :  { %1284 = vmatpush3.bf16.msra.mxu1 %v1283_v24  ;;  %v663_v24 = vld [vmem:[%s1866_s2 + $0x310] sm:$0xff] }
  0xea   :  { %1308 = vmatpush3.bf16.msra.mxu0 %v1307_v25  ;;  %1285 = vmatprep.subr.bf16.mxu1 %v1393_v3  ;;  %v1343_v25 = vpack.c.bf16 %v662_v23, %v661_v22  ;;  %v1346_v27 = vpack.c.bf16 %v664_v26, %v663_v24 }
  0xeb   :  { %1309 = vmatprep.subr.bf16.mxu0 %v1393_v3 }
  0xed   :  { %1287 = vmatpush3.bf16.msra.mxu1 %v1286_v30  ;;  %v1349_v30 = vpack.c.bf16 %v666_v29, %v665_v28 }
  0xee   :  { %1311 = vmatpush3.bf16.msra.mxu0 %v1310_v31  ;;  %1288 = vmatprep.subr.bf16.mxu1 %v1393_v3  ;;  %v667_v31 = vld [vmem:[%s1866_s2 + $0x330] sm:$0xff] }
  0xef   :  { %1312 = vmatprep.subr.bf16.mxu0 %v1393_v3  ;;  %v1352_v33 = vpack.c.bf16 %v668_v32, %v667_v31 }
  0xf1   :  { %1290 = vmatpush3.bf16.msra.mxu1 %v1289_v36  ;;  %v1355_v36 = vpack.c.bf16 %v670_v35, %v669_v34 }
  0xf2   :  { %1314 = vmatpush3.bf16.msra.mxu0 %v1313_v37  ;;  %1291 = vmatprep.subr.bf16.mxu1 %v1393_v3  ;;  %v671_v37 = vld [vmem:[%s1866_s2 + $0x350] sm:$0xff] }
  0xf3   :  { %1315 = vmatprep.subr.bf16.mxu0 %v1393_v3  ;;  %v1358_v39 = vpack.c.bf16 %v672_v38, %v671_v37 }
  0xf5   :  { %1293 = vmatpush3.bf16.msra.mxu1 %v1292_v42  ;;  %v1361_v42 = vpack.c.bf16 %v674_v41, %v673_v40 }
  0xf6   :  { %1317 = vmatpush3.bf16.msra.mxu0 %v1316_v43  ;;  %v645_v43 = vld [vmem:[%s1866_s2 + $0x280] sm:$0xff] }
  0xf7   :  { %1318 = vmatprep.subr.bf16.mxu0 %v1393_v3 }
  0xf8   :  { %1075 = vmatmul.mubr.f32.vlgmr.msra.gmra.mrb[6].mxu1 %v108_v11 }
  0xf9   :  { %1110 = vmatmul.mubr.f32.vlgmr.msra.gmra.mrb[2].mxu0 %v1591_v10  ;;  %1114 = vmatprep.mubr.msk.f32.mxu1 %vm19_vm0, %v470_v44  ;;  %v646_v44 = vld [vmem:[%s1866_s2 + $0x288] sm:$0xff] }
  0xfa   :  { %1149 = vmatprep.mubr.msk.f32.mxu0 %vm1394_vm1, %v1395_v54  ;;  %1320 = vmatpush3.bf16.msra.mxu0 %v1319_v48  ;;  %v1367_v45 = vpack.c.bf16 %v646_v44, %v645_v43 }
  0xfb   :  { %1321 = vmatprep.subr.bf16.mxu0 %v1393_v3 }
  0xfe   :  { %1323 = vmatpush3.bf16.msra.mxu0 %v1322_v50  ;;  %v1370_v50 = vpack.c.bf16 %v648_v47, %v647_v46 }
  0xff   :  { %1324 = vmatprep.subr.bf16.mxu0 %v1393_v3 }
 0x102   :  { %1326 = vmatpush3.bf16.msra.mxu0 %v1325_v53  ;;  %v1373_v53 = vpack.c.bf16 %v650_v52, %v649_v51 }
 0x103   :  { %1327 = vmatprep.subr.bf16.mxu0 %v1393_v3 }
 0x106   :  { %1329 = vmatpush3.bf16.msra.mxu0 %v1328_v57  ;;  %v653_v57 = vld [vmem:[%s1866_s2 + $0x2c0] sm:$0xff] }
 0x107   :  { %1330 = vmatprep.subr.bf16.mxu0 %v1393_v3  ;;  %v1379_v59 = vpack.c.bf16 %v654_v58, %v653_v57 }
 0x10a   :  { %1332 = vmatpush3.bf16.msra.mxu0 %v1331_v60  ;;  %v655_v60 = vld [vmem:[%s1866_s2 + $0x2d0] sm:$0xff] }
 0x10b   :  { %1333 = vmatprep.subr.bf16.mxu0 %v1393_v3  ;;  %v1382_v62 = vpack.c.bf16 %v656_v61, %v655_v60 }
 0x10e   :  { %1335 = vmatpush3.bf16.msra.mxu0 %v1334_v63  ;;  %v657_v63 = vld [vmem:[%s1866_s2 + $0x2e0] sm:$0xff] }
 0x10f   :  { %1336 = vmatprep.subr.bf16.mxu0 %v1393_v3  ;;  %v1385_v1 = vpack.c.bf16 %v658_v0, %v657_v63 }
 0x112   :  { %1338 = vmatpush3.bf16.msra.mxu0 %v1337_v2  ;;  %v659_v2 = vld [vmem:[%s1866_s2 + $0x2f0] sm:$0xff] }
 0x113   :  { %1339 = vmatprep.subr.bf16.mxu0 %v1393_v3  ;;  %v1388_v5 = vpack.c.bf16 %v660_v4, %v659_v2 }
 0x116   :  { %1341 = vmatpush3.bf16.msra.mxu0 %v1340_v6  ;;  %v675_v6 = vld [vmem:[%s1866_s2 + $0x370] sm:$0xff] }
 0x117   :  { %1366 = vmatprep.subr.bf16.mxu0 %v1393_v3 }
 0x1ab   :  { %v215_v7 = vpop.f32.mrb[4].mxu1 }
 0x1ac   :  { %v1006_v8 = vpop.f32.mrb[5].mxu1  ;;  %v285_v9 = vpop.f32.mrb[0].mxu0 }
 0x1ad   :  { %v286_v10 = vadd.f32 %v285_v9, %v215_v7  ;;  %v1041_v11 = vpop.f32.mrb[1].mxu0  ;;  %v676_v7 = vld [vmem:[%s1866_s2 + $0x378] sm:$0xff]  ;;  %v835_v9 = vld [vmem:[%s1866_s2 + $0x381] ss:$0 sm:$0xff] }
 0x1ae   :  { %v1364_v8 = vpack.c.bf16 %v676_v7, %v675_v6 }
 0x1cb   :  { %v371_v12 = vpop.f32.mrb[6].mxu1 }
 0x1cc   :  { %v375_v13 = vadd.f32 %v371_v12, %v286_v10  ;;  %v1076_v14 = vpop.f32.mrb[7].mxu1  ;;  %v458_v15 = vpop.f32.mrb[2].mxu0 }
 0x1cd   :  { %v1111_v17 = vpop.f32.mrb[3].mxu0 }
 0x1ce   :  { %v462_v18 = vadd.f32 %v458_v15, %v375_v13 }
 0x1d0   :  { %v468_v19 = vadd.f32 %v832_v16, %v462_v18  ;;  %v836_v16 = vld [vmem:[%s1866_s2 + $0x382] ss:$0 sm:$0xff] }
 0x1d2   :  { %v469_v20 = vmax.f32 %v468_v19, 0.0 }
 0x1d4   :  { %1112 = vmatprep.subr.mxu1 %v469_v20 }
 0x1d5   :  { %1113 = vmatpush3.msra.mxu1 %v469_v20 }
 0x1d6   :  { %1115 = vmatmul.mubr.msk.f32.vlgmr.msra.gmra.mrb[8].mxu1 %vm19_vm0, %v471_v21  ;;  %1342 = vmatprep.subr.bf16.mxu1 %v1393_v3 }
 0x1d7   :  { %1184 = vmatprep.mubr.msk.f32.mxu1 %vm1394_vm1, %v1395_v54  ;;  %1344 = vmatpush3.bf16.msra.mxu1 %v1343_v25 }
 0x1d8   :  { %1345 = vmatprep.subr.bf16.mxu1 %v1393_v3 }
 0x1db   :  { %1347 = vmatpush3.bf16.msra.mxu1 %v1346_v27 }
 0x1dc   :  { %1348 = vmatprep.subr.bf16.mxu1 %v1393_v3 }
 0x1df   :  { %1350 = vmatpush3.bf16.msra.mxu1 %v1349_v30 }
 0x1e0   :  { %1351 = vmatprep.subr.bf16.mxu1 %v1393_v3 }
 0x1e3   :  { %1353 = vmatpush3.bf16.msra.mxu1 %v1352_v33 }
 0x1e4   :  { %1354 = vmatprep.subr.bf16.mxu1 %v1393_v3 }
 0x1e7   :  { %1356 = vmatpush3.bf16.msra.mxu1 %v1355_v36 }
 0x1e8   :  { %1357 = vmatprep.subr.bf16.mxu1 %v1393_v3 }
 0x1eb   :  { %1359 = vmatpush3.bf16.msra.mxu1 %v1358_v39 }
 0x1ec   :  { %1360 = vmatprep.subr.bf16.mxu1 %v1393_v3 }
 0x1ef   :  { %1362 = vmatpush3.bf16.msra.mxu1 %v1361_v42 }
 0x1f0   :  { %1363 = vmatprep.subr.bf16.mxu1 %v1393_v3 }
 0x1f3   :  { %1365 = vmatpush3.bf16.msra.mxu1 %v1364_v8 }
 0x2a9   :  { %v1116_v48 = vpop.f32.mrb[8].mxu1 }
 0x2aa   :  { %1150 = vmatmul.mubr.f32.vlgmr.msra.gmra.mrb[4].mxu0 %v1116_v48  ;;  %v544_v49 = vpop.f32.mrb[9].mxu1 }
 0x2ab   :  { %1368 = vmatpush3.bf16.msra.mxu0 %v1367_v45  ;;  %1219 = vmatprep.mubr.msk.f32.mxu0 %vm1394_vm1, %v1395_v54  ;;  %v652_v54 = vld [vmem:[%s1866_s2 + $0x2b8] sm:$0xff] }
 0x2ac   :  { %1369 = vmatprep.subr.bf16.mxu0 %v1393_v3  ;;  %v1376_v56 = vpack.c.bf16 %v652_v54, %v651_v55 }
 0x2af   :  { %1371 = vmatpush3.bf16.msra.mxu0 %v1370_v50 }
 0x2b0   :  { %1372 = vmatprep.subr.bf16.mxu0 %v1393_v3 }
 0x2b3   :  { %1374 = vmatpush3.bf16.msra.mxu0 %v1373_v53 }
 0x2b4   :  { %1375 = vmatprep.subr.bf16.mxu0 %v1393_v3 }
 0x2b7   :  { %1377 = vmatpush3.bf16.msra.mxu0 %v1376_v56 }
 0x2b8   :  { %1378 = vmatprep.subr.bf16.mxu0 %v1393_v3 }
 0x2bb   :  { %1380 = vmatpush3.bf16.msra.mxu0 %v1379_v59 }
 0x2bc   :  { %1381 = vmatprep.subr.bf16.mxu0 %v1393_v3 }
 0x2bf   :  { %1383 = vmatpush3.bf16.msra.mxu0 %v1382_v62 }
 0x2c0   :  { %1384 = vmatprep.subr.bf16.mxu0 %v1393_v3 }
 0x2c3   :  { %1386 = vmatpush3.bf16.msra.mxu0 %v1385_v1 }
 0x2c4   :  { %1387 = vmatprep.subr.bf16.mxu0 %v1393_v3 }
 0x2c7   :  { %1389 = vmatpush3.bf16.msra.mxu0 %v1388_v5 }
 0x2ca   :  { %1220 = vmatmul.mubr.f32.vlgmr.msra.gmra.mrb[6].mxu0 %v544_v49 }
 0x37d   :  { %v640_v10 = vpop.f32.mrb[4].mxu0 }
 0x37e   :  { %v641_v11 = vadd.f32 %v835_v9, %v640_v10  ;;  %v1151_v12 = vpop.f32.mrb[5].mxu0 }
 0x380   :  { %v644_v3 = vmax.f32 %v641_v11, 0.0 }
 0x382   :  { %1185 = vmatmul.mubr.f32.vlgmr.msra.gmra.mrb[10].mxu1 %v644_v3 }
 0x39d   :  { %v813_v13 = vpop.f32.mrb[6].mxu0 }
 0x39e   :  { %v1221_v14 = vpop.f32.mrb[7].mxu0 }
 0x455   :  { %v743_v15 = vpop.f32.mrb[10].mxu1 }
 0x456   :  { %v814_v17 = vadd.f32 %v813_v13, %v743_v15  ;;  %v1186_v18 = vpop.f32.mrb[11].mxu1 }
 0x458   :  { %v822_v19 = vadd.f32 %v836_v16, %v814_v17 }
 0x45a   :  { %823 = vst [vmem:[%s1867_s3] sm:$0xff] %v822_v19 }

</bundles_post_ra>
